<compile_context>
chip_gen: v5e
topology: v5e:2x2
jax: 0.10.0
libtpu: 0.0.40
codegen_flags: <defaults>
</compile_context>

<pallas_src>
import jax
import jax.numpy as jnp
from jax.experimental import pallas as pl
from jax.experimental.pallas import tpu as pltpu

_MIB = 1024 * 1024


# ---------------------------------------------------------------------------
# Chip-generation-aware VMEM budgeting
# ---------------------------------------------------------------------------
def _vmem_budgets():
    """Return (tile_budget_bytes, vmem_limit_bytes) for the current chip."""
    phys = None
    try:
        phys = int(pltpu.get_tpu_info().vmem_capacity_bytes)
    except Exception:
        phys = None
    if phys is None:
        # Unknown chip: use v7x-safe defaults (64 MiB physical VMEM per TC).
        return 12 * _MIB, 32 * _MIB
    if phys >= 100 * _MIB:
        # v5e / v6e: 128 MiB physical VMEM per TensorCore.
        return 24 * _MIB, 64 * _MIB
    # v7x-class (64 MiB per TensorCore): keep at most half of physical scoped.
    limit = max(32 * _MIB, phys // 2)
    return min(12 * _MIB, limit // 2), limit


def _sublane_granule(dtype):
    """Sublane packing granule: 8 for 4-byte, 16 for 2-byte, 32 for 1-byte."""
    itemsize = jnp.dtype(dtype).itemsize
    return max(8, 32 // max(1, itemsize))


# ---------------------------------------------------------------------------
# policy = 'add'
# ---------------------------------------------------------------------------
def _add_kernel(*refs):
    """refs = (x_0, ..., x_{n-1}, o). Sums all N input tiles, writes once."""
    o_ref = refs[-1]
    x_refs = refs[:-1]
    if jnp.issubdtype(o_ref.dtype, jnp.floating):
        acc_dtype = jnp.promote_types(o_ref.dtype, jnp.float32)
    else:
        acc_dtype = o_ref.dtype
    acc = x_refs[0][...].astype(acc_dtype)
    for x_ref in x_refs[1:]:
        acc = acc + x_ref[...].astype(acc_dtype)
    o_ref[...] = acc.astype(o_ref.dtype)


def _lane_dense_2d(shape, granule):
    """Pick a (rows, lanes) factorization: lanes a multiple of 128, and prefer
    a rows count that is a whole number of sublane granules (no vreg padding)."""
    total = 1
    for d in shape:
        total *= int(d)
    lane_choices = (2048, 1024, 512, 256, 128)
    # 1st preference: rows is a granule multiple.
    for lanes in lane_choices:
        if total % lanes == 0 and (total // lanes) % granule == 0:
            return total // lanes, lanes
    # 2nd preference: rows at least one granule.
    for lanes in lane_choices:
        if total % lanes == 0 and total // lanes >= granule:
            return total // lanes, lanes
    # 3rd preference: any 128-multiple lane count.
    for lanes in lane_choices:
        if total % lanes == 0:
            return total // lanes, lanes
    # Fallback for odd sizes: innermost dim as lanes (full-extent block on it).
    if len(shape) >= 2:
        lanes = int(shape[-1])
        return total // lanes, lanes
    return 1, total


def _pick_row_block(rows, lanes, n_inputs, itemsize, granule, budget_bytes):
    """Largest granule-multiple row tile whose double-buffered (N inputs + 1
    output) footprint fits the budget. No exact-divisor requirement: the grid
    uses pl.cdiv and Pallas masks the ragged last block."""
    bytes_per_row = (n_inputs + 1) * 2 * lanes * itemsize  # dbl-buffered in+out
    max_rows = max(granule, budget_bytes // bytes_per_row)
    if rows <= max_rows:
        return rows
    return max(granule, (max_rows // granule) * granule)


def _merge_add(xs):
    n = len(xs)
    shape = tuple(int(d) for d in xs[0].shape)
    dtype = xs[0].dtype
    for xi in xs:
        if tuple(int(d) for d in xi.shape) != shape or xi.dtype != dtype:
            raise ValueError("'add' policy requires identical shapes/dtypes")

    granule = _sublane_granule(dtype)
    rows, lanes = _lane_dense_2d(shape, granule)
    itemsize = jnp.dtype(dtype).itemsize
    budget_bytes, vmem_limit = _vmem_budgets()
    row_blk = _pick_row_block(rows, lanes, n, itemsize, granule, budget_bytes)
    grid = (pl.cdiv(rows, row_blk),)   # ragged last block masked by Pallas
    total = rows * lanes

    xs_2d = [xi.reshape(rows, lanes) for xi in xs]

    def _spec():
        return pl.BlockSpec((row_blk, lanes), lambda i: (i, 0))

    # TODO(synk): for very large N (>= ~6 inputs) on v7x, switch to a manual
    # inner loop over inputs (memory_space=pl.ANY + 2-deep VMEM double buffer,
    # pattern P4) so VMEM residency stays ~4 buffers instead of 2*(N+1); not
    # needed at FPN's N=4.
    out = pl.pallas_call(
        _add_kernel,
        out_shape=jax.ShapeDtypeStruct((rows, lanes), dtype),
        grid=grid,
        in_specs=[_spec() for _ in range(n)],
        out_specs=_spec(),
        compiler_params=pltpu.CompilerParams(
            # NOTE: on v7x (2 TCs/chip) confirm in a profile that this single
            # parallel axis shards across both cores; if not, switch to
            # pltpu.CORE_PARALLEL.
            dimension_semantics=("parallel",),
            vmem_limit_bytes=vmem_limit,
        ),
        cost_estimate=pl.CostEstimate(
            flops=(n - 1) * total,
            transcendentals=0,
            bytes_accessed=(n + 1) * total * itemsize,
        ),
    )(*xs_2d)
    return out.reshape(shape)


# ---------------------------------------------------------------------------
# policy = 'cat'  (channel concat == pure data movement -> HBM->HBM DMA)
# ---------------------------------------------------------------------------
def _merge_cat(xs):
    n = len(xs)
    dtype = xs[0].dtype
    b = int(xs[0].shape[0])
    h, w = int(xs[0].shape[2]), int(xs[0].shape[3])
    chans = [int(xi.shape[1]) for xi in xs]
    for xi in xs:
        if (xi.dtype != dtype or int(xi.shape[0]) != b
                or int(xi.shape[2]) != h or int(xi.shape[3]) != w):
            raise ValueError("'cat' policy requires matching B/H/W and dtype")

    offs, off = [], 0
    for c in chans:
        offs.append(off)
        off += c
    total_c = off
    itemsize = jnp.dtype(dtype).itemsize
    total_elems = b * total_c * h * w

    def cat_kernel(*args):
        x_refs = args[:n]
        o_ref = args[n]
        sem = args[n + 1]
        copies = []
        # One strided HBM->HBM DMA per input: the whole (B, C_j, H, W) slab is
        # placed at its channel offset -- contiguous C_j*H*W run per batch,
        # strided across batches.  n descriptors total instead of n*b.
        for j in range(n):
            cp = pltpu.make_async_copy(
                x_refs[j],                                   # (B, C_j, H, W) HBM
                o_ref.at[:, pl.ds(offs[j], chans[j])],       # (B, C_j, H, W) HBM
                sem.at[j],
            )
            cp.start()
            copies.append(cp)
        for cp in copies:
            cp.wait()

    return pl.pallas_call(
        cat_kernel,
        out_shape=jax.ShapeDtypeStruct((b, total_c, h, w), dtype),
        in_specs=[pl.BlockSpec(memory_space=pl.ANY) for _ in range(n)],
        out_specs=pl.BlockSpec(memory_space=pl.ANY),
        scratch_shapes=[pltpu.SemaphoreType.DMA((n,))],
        compiler_params=pltpu.CompilerParams(has_side_effects=True),
        cost_estimate=pl.CostEstimate(
            flops=0,
            transcendentals=0,
            bytes_accessed=2 * total_elems * itemsize,
        ),
    )(*xs)


# ---------------------------------------------------------------------------
# Module wrapper
# ---------------------------------------------------------------------------
class MergeBlock:
    """Pallas equivalent of the PyTorch MergeBlock."""

    def __init__(self, policy):
        if policy not in ("add", "cat"):
            raise ValueError(
                "`merge_policy` must be one of: ['add', 'cat'], got {}".format(policy)
            )
        self.policy = policy

    def __call__(self, x):
        xs = list(x)
        if self.policy == "add":
            return _merge_add(xs)
        return _merge_cat(xs)


if __name__ == "__main__":
    # N=4 FPN segmentation branches of shape (B=2, C=4, H=16, W=16).
    key = jax.random.PRNGKey(0)
    keys = jax.random.split(key, 4)
    feats = [
        jax.random.normal(k, (2, 4, 16, 16), dtype=jnp.float32) for k in keys
    ]

    # --- policy = 'add' ---
    merge_add = MergeBlock("add")
    out_add = jax.block_until_ready(merge_add(feats))
    ref_add = sum(feats)
    assert out_add.shape == (2, 4, 16, 16)
    assert jnp.allclose(out_add, ref_add, atol=1e-5), "add mismatch"

    # --- policy = 'cat' ---
    merge_cat = MergeBlock("cat")
    out_cat = jax.block_until_ready(merge_cat(feats))
    ref_cat = jnp.concatenate(feats, axis=1)
    assert out_cat.shape == (2, 16, 16, 16)
    assert jnp.allclose(out_cat, ref_cat), "cat mismatch"

    print("KERNEL_OK")
</pallas_src>

<mosaic_0001>
module attributes {stable_mosaic.version = 11 : i64} {
  func.func @_add_kernel(%arg0: i32, %arg1: memref<8x256xf32, #tpu.memory_space<vmem>>, %arg2: memref<8x256xf32, #tpu.memory_space<vmem>>, %arg3: memref<8x256xf32, #tpu.memory_space<vmem>>, %arg4: memref<8x256xf32, #tpu.memory_space<vmem>>, %arg5: memref<8x256xf32, #tpu.memory_space<vmem>>) attributes {dimension_semantics = [#tpu.dimension_semantics<parallel>], iteration_bounds = array<i64: 1>, scalar_prefetch = 0 : i64, scratch_operands = 0 : i64, tpu.core_type = #tpu.core_type<tc>, window_params = [{transform_indices = @transform_0, window_bounds = array<i64: 8, 256>}, {transform_indices = @transform_1, window_bounds = array<i64: 8, 256>}, {transform_indices = @transform_2, window_bounds = array<i64: 8, 256>}, {transform_indices = @transform_3, window_bounds = array<i64: 8, 256>}, {transform_indices = @transform_4, window_bounds = array<i64: 8, 256>}]} {
    %c0 = arith.constant 0 : index
    %c0_0 = arith.constant 0 : index
    %0 = vector.load %arg1[%c0, %c0_0] : memref<8x256xf32, #tpu.memory_space<vmem>>, vector<8x256xf32>
    %c0_1 = arith.constant 0 : index
    %c0_2 = arith.constant 0 : index
    %1 = vector.load %arg2[%c0_1, %c0_2] : memref<8x256xf32, #tpu.memory_space<vmem>>, vector<8x256xf32>
    %2 = arith.addf %0, %1 : vector<8x256xf32>
    %c0_3 = arith.constant 0 : index
    %c0_4 = arith.constant 0 : index
    %3 = vector.load %arg3[%c0_3, %c0_4] : memref<8x256xf32, #tpu.memory_space<vmem>>, vector<8x256xf32>
    %4 = arith.addf %2, %3 : vector<8x256xf32>
    %c0_5 = arith.constant 0 : index
    %c0_6 = arith.constant 0 : index
    %5 = vector.load %arg4[%c0_5, %c0_6] : memref<8x256xf32, #tpu.memory_space<vmem>>, vector<8x256xf32>
    %6 = arith.addf %4, %5 : vector<8x256xf32>
    %c0_7 = arith.constant 0 : index
    %c0_8 = arith.constant 0 : index
    %7 = vector.load %arg5[%c0_7, %c0_8] : memref<8x256xf32, #tpu.memory_space<vmem>>, vector<8x256xf32>
    tpu.vector_store %arg5[%c0_7, %c0_8], %6 {strides = array<i32>} : memref<8x256xf32, #tpu.memory_space<vmem>>, vector<8x256xf32>,
    return
  }
  func.func @transform_0(%arg0: i32) -> (i32, i32) {
    %c0_i32 = arith.constant 0 : i32
    %c0_i32_0 = arith.constant 0 : i32
    return %arg0, %c0_i32 : i32, i32
  }
  func.func @transform_1(%arg0: i32) -> (i32, i32) {
    %c0_i32 = arith.constant 0 : i32
    %c0_i32_0 = arith.constant 0 : i32
    return %arg0, %c0_i32 : i32, i32
  }
  func.func @transform_2(%arg0: i32) -> (i32, i32) {
    %c0_i32 = arith.constant 0 : i32
    %c0_i32_0 = arith.constant 0 : i32
    return %arg0, %c0_i32 : i32, i32
  }
  func.func @transform_3(%arg0: i32) -> (i32, i32) {
    %c0_i32 = arith.constant 0 : i32
    %c0_i32_0 = arith.constant 0 : i32
    return %arg0, %c0_i32 : i32, i32
  }
  func.func @transform_4(%arg0: i32) -> (i32, i32) {
    %c0_i32 = arith.constant 0 : i32
    %c0_i32_0 = arith.constant 0 : i32
    return %arg0, %c0_i32 : i32, i32
  }
}

</mosaic_0001>

<bundles_post_ra>
// kernel: tpu_custom_call.1
= control target key start
LH: loop header
LB: loop body
LE: loop exit
PB: predicated region body
PF: predicated region fallthrough
CT: control target
= control target key end

     0   :  { %9 = vsyncpa [#allocation3], 0  ;;  %s286_s0 = inlined_call_operand.hbm [shape: f32[8,256], index: 0, kind: input, shape index: {}]   ;;  %s287_s1 = inlined_call_operand.hbm [shape: f32[8,256], index: 1, kind: input, shape index: {}]   ;;  %s288_s2 = inlined_call_operand.hbm [shape: f32[8,256], index: 2, kind: input, shape index: {}]   ;;  %s289_s3 = inlined_call_operand.hbm [shape: f32[8,256], index: 3, kind: input, shape index: {}]   ;;  %s290_s4 = inlined_call_operand.hbm [shape: f32[8,256], index: 4, kind: output, shape index: {}]  }
   0x1   :  { %10 = vsyncpa [#allocation6], 0 }
   0x2   :  { %11 = vsyncpa [#allocation9], 0  ;;  %s29_s17 = sshll.u32 %s287_s1, 4  ;;  %s30_s17 = int_to_ptr.hbm [resolvable:$true] %s29_s17 }
   0x3   :  { %12 = vsyncpa [#allocation4], 0  ;;  %s241_s18 = smov [#allocation5]   ;;  %s18_s22 = sshll.u32 %s286_s0, 4  ;;  %s19_s22 = int_to_ptr.hbm [resolvable:$true] %s18_s22 }
   0x4   :  { %s31_s19 = sshll.u32 %s241_s18, 4  ;;  %s242_s23 = smov [#allocation2]   ;;  %s32_s19 = int_to_ptr.vmem [resolvable:$true] %s31_s19 }
   0x5   :  { %34 = dma.hbm_to_vmem [thread:$0]  %s30_s17, 256, %s32_s19, [#allocation6]  }
   0x6   :  { %s20_s24 = sshll.u32 %s242_s23, 4  ;;  %s40_s27 = sshll.u32 %s288_s2, 4  ;;  %s21_s24 = int_to_ptr.vmem [resolvable:$true] %s20_s24  ;;  %s41_s27 = int_to_ptr.hbm [resolvable:$true] %s40_s27 }
   0x7   :  { %23 = dma.hbm_to_vmem [thread:$0]  %s19_s22, 256, %s21_s24, [#allocation3]  }
   0x8   :  { %s51_s29 = sshll.u32 %s289_s3, 4  ;;  %s243_s30 = smov [#allocation7]   ;;  %s52_s29 = int_to_ptr.hbm [resolvable:$true] %s51_s29 }
   0x9   :  { %s42_s5 = sshll.u32 %s243_s30, 4  ;;  %s244_s0 = smov [#allocation8]   ;;  %s43_s5 = int_to_ptr.vmem [resolvable:$true] %s42_s5 }
   0xa   :  { %45 = dma.hbm_to_vmem [thread:$0]  %s41_s27, 256, %s43_s5, [#allocation6]  }
   0xb   :  { %s53_s6 = sshll.u32 %s244_s0, 4  ;;  %s54_s6 = int_to_ptr.vmem [resolvable:$true] %s53_s6 }
   0xc   :  { %56 = dma.hbm_to_vmem [thread:$0]  %s52_s29, 256, %s54_s6, [#allocation9]  }
   0xd   :  { %233 = dma.done.wait [#allocation3], 256  }
   0xe   :  { %234 = vsyncadd [#allocation3], 4294967040 }
   0xf   :  { %235 = dma.done.wait [#allocation6], 512  }
  0x10   :  { %236 = vsyncadd [#allocation6], 4294966784 }
  0x11   :  { %237 = dma.done.wait [#allocation9], 256  }
  0x12   :  { %238 = vsyncadd [#allocation9], 4294967040  ;;  %v73_v0 = vld [vmem:[#allocation2] sm:$0xff]  ;;  %v75_v1 = vld [vmem:[#allocation5] sm:$0xff]  ;;  %s245_s2 = smov [#allocation10]   ;;  %s96_s9 = sshll.u32 %s290_s4, 4  ;;  %s97_s9 = int_to_ptr.hbm [resolvable:$true] %s96_s9 }
  0x13   :  { %v79_v2 = vld [vmem:[#allocation7] sm:$0xff]  ;;  %v77_v3 = vadd.f32 %v75_v1, %v73_v0  ;;  %v74_v4 = vld [vmem:[#allocation2 + $0x8] sm:$0xff]  ;;  %v76_v5 = vld [vmem:[#allocation5 + $0x8] sm:$0xff]  ;;  %s94_s3 = sshll.u32 %s245_s2, 4  ;;  %s95_s3 = int_to_ptr.vmem [resolvable:$true] %s94_s3 }
  0x14   :  { %v83_v6 = vld [vmem:[#allocation8] sm:$0xff]  ;;  %v78_v7 = vadd.f32 %v76_v5, %v74_v4  ;;  %v80_v8 = vld [vmem:[#allocation7 + $0x8] sm:$0xff]  ;;  %v84_v10 = vld [vmem:[#allocation8 + $0x8] sm:$0xff] }
  0x15   :  { %v81_v9 = vadd.f32 %v79_v2, %v77_v3 }
  0x16   :  { %v82_v11 = vadd.f32 %v80_v8, %v78_v7 }
  0x17   :  { %v85_v12 = vadd.f32 %v83_v6, %v81_v9 }
  0x18   :  { %v86_v13 = vadd.f32 %v84_v10, %v82_v11 }
  0x19   :  { %87 = vst [vmem:[#allocation10] sm:$0xff] %v85_v12 }
  0x1a   :  { %88 = vst [vmem:[#allocation10 + $0x8] sm:$0xff] %v86_v13 }
  0x1b   :  { %99 = dma.vmem_to_hbm [thread:$0]  %s95_s3, 256, %s97_s9, [#allocation4]  }
  0x1c   :  { %239 = dma.done.wait [#allocation4], 256  }
  0x1d   :  { %240 = vsyncadd [#allocation4], 4294967040 }
  0x1e   :  { %104 = vsyncpa [#allocation3], 1 }
  0x1f   :  { %105 = vsyncpa [#allocation6], 1 }
  0x20   :  { %106 = vsyncpa [#allocation9], 1 }
  0x21   :  { %107 = vsyncpa [#allocation4], 1 }

</bundles_post_ra>
